<compile_context>
chip_gen: v6e
topology: v6e:2x2x1
jax: 0.10.0
libtpu: 0.0.40
codegen_flags: <defaults>
</compile_context>

<pallas_src>
import jax
import jax.numpy as jnp
from jax.experimental import pallas as pl
from jax.experimental.pallas import tpu as pltpu


_LANE = 128
_MAX_COL_TILE = 4096          # default lane-tile cap (widened if rows are few)


def _cdiv(a, b):
    return -(-a // b)


def _round_up(x, m):
    return _cdiv(x, m) * m


def _chip_tuning():
    """Return (target block bytes, scoped VMEM limit) keyed off physical VMEM.

    v5e / v6e have 128 MiB VMEM -> 8 MiB blocks, 64 MiB scoped limit.
    v7x has 64 MiB VMEM (and much higher HBM BW) -> 4 MiB blocks, 32 MiB limit.
    Unknown / query failure -> the conservative v7x numbers (safe everywhere).
    """
    try:
        info = pltpu.get_tpu_info()
        vmem_bytes = int(getattr(info, "vmem_capacity_bytes", 0) or 0)
    except Exception:
        vmem_bytes = 0
    if vmem_bytes >= 96 * 1024 * 1024:
        return 8 * 1024 * 1024, 64 * 1024 * 1024
    return 4 * 1024 * 1024, 32 * 1024 * 1024


def _compute_tiles(R, S, itemsize, target_bytes):
    """Pick (row_tile, col_tile): (8*packing, 128)-aligned, ~target_bytes."""
    packing = max(1, 4 // itemsize)          # f32 -> 1, bf16 -> 2, int8 -> 4
    row_align = 8 * packing                  # full packed-sublane vregs
    row_cap = _round_up(R, row_align)
    col_cap = _round_up(S, _LANE)
    target_elems = max(row_align * _LANE, target_bytes // itemsize)

    col_tile = min(col_cap, _MAX_COL_TILE)
    row_tile = min(
        row_cap,
        _round_up(max(row_align, _cdiv(target_elems, col_tile)), row_align))
    if row_tile == row_cap and row_tile * col_tile < target_elems:
        # Few channel rows: widen the lane tile instead so each block still
        # reaches the target size (lane-dense stores, fewer grid steps).
        col_tile = min(col_cap,
                       _round_up(max(_LANE, target_elems // row_tile), _LANE))
    return row_tile, col_tile


def _channel_dropout_kernel(x_ref, m_ref, o_ref):
    # x_ref / o_ref: (row_tile, col_tile) tile of the flattened activation.
    # m_ref: (row_tile, 1) float32 per-channel keep-mask, pre-scaled by
    #        1/(1-p).  Values are exactly 0 or 1/(1-p), so multiplying in the
    #        activation's native dtype matches PyTorch's in-dtype scaling.
    o_ref[...] = x_ref[...] * m_ref[...].astype(x_ref.dtype)


def _channel_dropout_2d(x2d, mask2d, *, row_tile, col_tile, vmem_limit_bytes):
    R, S = x2d.shape
    n_row = _cdiv(R, row_tile)
    n_col = _cdiv(S, col_tile)

    if n_col >= n_row:
        # Lead with the axis that has more blocks so v7x's two TensorCores can
        # shard it.  Neutral on single-TC chips (v5e / v6e).
        grid = (n_col, n_row)
        x_map = lambda j, i: (i, j)
        m_map = lambda j, i: (i, 0)
    else:
        grid = (n_row, n_col)
        x_map = lambda i, j: (i, j)
        m_map = lambda i, j: (i, 0)

    itemsize = jnp.dtype(x2d.dtype).itemsize
    cost = pl.CostEstimate(
        flops=R * S,
        transcendentals=0,
        bytes_accessed=2 * R * S * itemsize + mask2d.size * 4,
    )

    return pl.pallas_call(
        _channel_dropout_kernel,
        out_shape=jax.ShapeDtypeStruct((R, S), x2d.dtype),
        grid_spec=pltpu.PrefetchScalarGridSpec(
            num_scalar_prefetch=0,
            grid=grid,
            in_specs=[
                pl.BlockSpec((row_tile, col_tile), x_map),
                # Tiny per-row-block mask: plain read in the kernel, no
                # grid-resident block, negligible DMA.
                pl.BlockSpec((row_tile, 1), m_map),
            ],
            out_specs=pl.BlockSpec((row_tile, col_tile), x_map),
        ),
        compiler_params=pltpu.CompilerParams(
            dimension_semantics=("parallel", "parallel"),
            vmem_limit_bytes=vmem_limit_bytes,
        ),
        cost_estimate=cost,
    )(x2d, mask2d)


def channel_dropout(x_in, mask_rows, *, target_block_bytes=None):
    """Apply a per-(N, C) channel mask (already scaled by 1/(1-p)) to x_in.

    x_in: (N, C, *spatial); mask_rows: (N*C,) float-typed.
    """
    # TODO(synk): requires a batch dim (N, C, *spatial); PyTorch's Dropout2d
    # no-batch (C, H, W) behavior is not handled.
    shape = x_in.shape
    R = shape[0] * shape[1]
    S = 1
    for d in shape[2:]:
        S *= d
    x2d = x_in.reshape(R, S)                              # free metadata reshape
    mask2d = mask_rows.astype(jnp.float32).reshape(R, 1)

    chip_target, vmem_limit = _chip_tuning()
    if target_block_bytes is None:
        target_block_bytes = chip_target
    itemsize = jnp.dtype(x_in.dtype).itemsize
    row_tile, col_tile = _compute_tiles(R, S, itemsize, target_block_bytes)

    out2d = _channel_dropout_2d(
        x2d, mask2d, row_tile=row_tile, col_tile=col_tile,
        vmem_limit_bytes=vmem_limit)
    return out2d.reshape(shape)


class DropoutPrediction:
    """JAX/Pallas equivalent of the PyTorch DropoutPrediction module."""

    def __init__(self, inactive=False, ndims=3):
        assert ndims in (2, 3)
        self.ndims = ndims
        self.forever_inactive = inactive
        self._running = False
        self.p = 0.5
        self.dotype = "channel"

    def activate(self, p_out=None, dotype="channel"):
        self._running = True
        if dotype == "channel":
            self.p = p_out
            self.dotype = "channel"
        elif dotype == "alpha":
            # TODO(synk): nn.AlphaDropout (element-wise SELU-preserving dropout)
            # path not implemented; only the 'channel' dropout hot path is done.
            raise NotImplementedError
        else:
            raise NotImplementedError

    def deactivate(self):
        self._running = False

    def __call__(self, x_in, key=None):
        # Eval / inactive: nn.Dropout{2,3}d.eval() is identity -> skip the
        # kernel entirely (saves a full HBM read+write on the inference path).
        if (not self._running) or self.forever_inactive:
            return x_in
        if key is None:
            raise ValueError("key required when dropout is active")
        p = float(self.p)
        if p <= 0.0:
            return x_in
        if p >= 1.0:
            return jnp.zeros_like(x_in)
        N, C = x_in.shape[0], x_in.shape[1]
        keep = jax.random.bernoulli(key, 1.0 - p, shape=(N * C,))
        mask_rows = keep.astype(jnp.float32) / jnp.float32(1.0 - p)
        return channel_dropout(x_in, mask_rows)


if __name__ == "__main__":
    key = jax.random.PRNGKey(0)
    (k_x, k_drop, k_x2, k_drop2, k_x3, k_drop3,
     k_x4, k_drop4, k_x5, k_drop5) = jax.random.split(key, 10)

    # ---- Path 1: default module (eval-mode dropout) -> identity, no kernel.
    x = jax.random.normal(k_x, (2, 4, 4, 8, 8), dtype=jnp.float32)  # NCDHW
    mod = DropoutPrediction(inactive=False, ndims=3)
    y_eval = jax.block_until_ready(mod(x))
    assert jnp.allclose(y_eval, x), "eval-mode dropout must be identity"

    # ---- Path 2: activated channel dropout with p=0.5 (train-mode Dropout3d).
    mod.activate(p_out=0.5, dotype="channel")
    y_train = jax.block_until_ready(mod(x, key=k_drop))
    keep_ref = jax.random.bernoulli(k_drop, 0.5, shape=(2 * 4,))
    mask_ref = (keep_ref.astype(jnp.float32) / 0.5).reshape(2, 4, 1, 1, 1)
    assert jnp.allclose(y_train, x * mask_ref), "channel dropout mismatch (f32)"

    # ---- Path 3: odd spatial / channel sizes -> ragged edge blocks (no pads).
    x_odd = jax.random.normal(k_x2, (1, 3, 5, 7, 9), dtype=jnp.float32)
    y_odd = jax.block_until_ready(mod(x_odd, key=k_drop2))
    keep_o = jax.random.bernoulli(k_drop2, 0.5, shape=(1 * 3,))
    mask_o = (keep_o.astype(jnp.float32) / 0.5).reshape(1, 3, 1, 1, 1)
    assert jnp.allclose(y_odd, x_odd * mask_o), "channel dropout mismatch (odd)"

    # ---- Path 4: bf16 input (native-dtype multiply, packed sublane tiling).
    x_bf = jax.random.normal(k_x3, (2, 4, 8, 8, 8), dtype=jnp.bfloat16)
    y_bf = jax.block_until_ready(mod(x_bf, key=k_drop3))
    keep_b = jax.random.bernoulli(k_drop3, 0.5, shape=(2 * 4,))
    mask_b = (keep_b.astype(jnp.float32) / 0.5).reshape(2, 4, 1, 1, 1)
    y_bf_ref = (x_bf.astype(jnp.float32) * mask_b).astype(jnp.bfloat16)
    assert jnp.allclose(y_bf.astype(jnp.float32), y_bf_ref.astype(jnp.float32),
                        rtol=1e-2, atol=1e-2), "channel dropout mismatch (bf16)"

    # ---- Path 5: force multi row-block grid (row-leading) with ragged edges.
    x5 = jax.random.normal(k_x4, (2, 10, 3, 17, 33), dtype=jnp.float32)
    keep5 = jax.random.bernoulli(k_drop4, 0.5, shape=(2 * 10,))
    rows5 = keep5.astype(jnp.float32) / 0.5
    y5 = jax.block_until_ready(
        channel_dropout(x5, rows5, target_block_bytes=64 * 1024))
    assert jnp.allclose(y5, x5 * rows5.reshape(2, 10, 1, 1, 1)), \
        "channel dropout mismatch (multi row-block)"

    # ---- Path 6: force multi col-block grid (col-leading / v7x ordering).
    x6 = jax.random.normal(k_x5, (1, 6, 4, 40, 40), dtype=jnp.float32)
    keep6 = jax.random.bernoulli(k_drop5, 0.5, shape=(1 * 6,))
    rows6 = keep6.astype(jnp.float32) / 0.5
    y6 = jax.block_until_ready(
        channel_dropout(x6, rows6, target_block_bytes=64 * 1024))
    assert jnp.allclose(y6, x6 * rows6.reshape(1, 6, 1, 1, 1)), \
        "channel dropout mismatch (multi col-block)"

    print("KERNEL_OK")
</pallas_src>

<mosaic_0001>
module attributes {stable_mosaic.version = 11 : i64} {
  func.func @_channel_dropout_kernel(%arg0: i32, %arg1: i32, %arg2: memref<8x256xf32, #tpu.memory_space<vmem>>, %arg3: memref<8x1xf32, #tpu.memory_space<vmem>>, %arg4: memref<8x256xf32, #tpu.memory_space<vmem>>) attributes {dimension_semantics = [#tpu.dimension_semantics<parallel>, #tpu.dimension_semantics<parallel>], iteration_bounds = array<i64: 1, 1>, scalar_prefetch = 0 : i64, scratch_operands = 0 : i64, tpu.core_type = #tpu.core_type<tc>, window_params = [{transform_indices = @transform_0, window_bounds = array<i64: 8, 256>}, {transform_indices = @transform_1, window_bounds = array<i64: 8, 1>}, {transform_indices = @transform_2, window_bounds = array<i64: 8, 256>}]} {
    %c0 = arith.constant 0 : index
    %c0_0 = arith.constant 0 : index
    %0 = vector.load %arg2[%c0, %c0_0] : memref<8x256xf32, #tpu.memory_space<vmem>>, vector<8x256xf32>
    %c0_1 = arith.constant 0 : index
    %c0_2 = arith.constant 0 : index
    %1 = vector.load %arg3[%c0_1, %c0_2] : memref<8x1xf32, #tpu.memory_space<vmem>>, vector<8x1xf32>
    %2 = vector.broadcast %1 : vector<8x1xf32> to vector<8x256xf32>
    %3 = arith.mulf %0, %2 : vector<8x256xf32>
    %c0_3 = arith.constant 0 : index
    %c0_4 = arith.constant 0 : index
    %4 = vector.load %arg4[%c0_3, %c0_4] : memref<8x256xf32, #tpu.memory_space<vmem>>, vector<8x256xf32>
    tpu.vector_store %arg4[%c0_3, %c0_4], %3 {strides = array<i32>} : memref<8x256xf32, #tpu.memory_space<vmem>>, vector<8x256xf32>,
    return
  }
  func.func @transform_0(%arg0: i32, %arg1: i32) -> (i32, i32) {
    %c0_i32 = arith.constant 0 : i32
    return %arg1, %arg0 : i32, i32
  }
  func.func @transform_1(%arg0: i32, %arg1: i32) -> (i32, i32) {
    %c0_i32 = arith.constant 0 : i32
    %c0_i32_0 = arith.constant 0 : i32
    return %arg1, %c0_i32 : i32, i32
  }
  func.func @transform_2(%arg0: i32, %arg1: i32) -> (i32, i32) {
    %c0_i32 = arith.constant 0 : i32
    return %arg1, %arg0 : i32, i32
  }
}

</mosaic_0001>

<bundles_post_ra>
// kernel: tpu_custom_call.1
= control target key start
LH: loop header
LB: loop body
LE: loop exit
PB: predicated region body
PF: predicated region fallthrough
CT: control target
= control target key end

     0   :  { %7 = vsyncpa [#allocation3], 0  ;;  %s126_s0 = inlined_call_operand.hbm [shape: f32[8,256], index: 0, kind: input, shape index: {}]   ;;  %s127_s1 = inlined_call_operand.vmem [shape: f32[8,1], index: 1, kind: input, shape index: {}]   ;;  %s128_s2 = inlined_call_operand.hbm [shape: f32[8,256], index: 2, kind: output, shape index: {}]  }
   0x1   :  { %8 = vsyncpa [#allocation4], 0  ;;  %s99_s9 = smov [#allocation2]  }
   0x2   :  { %s15_s10 = sshll.u32 %s99_s9, 4  ;;  %s16_s10 = int_to_ptr.vmem [resolvable:$true] %s15_s10 }
   0x3   :  { %s63_s11 = scalar_lea.vmem %s16_s10, 256  ;;  %p68_p1 = scmp.lt.s32.totalorder %s16_s10, %s16_s10 }
   0x4   :  { %p64_p0 = scmp.ne.s32.totalorder %s16_s10, %s63_s11  ;;  %p69_p2 = scmp.lt.s32.totalorder %s63_s11, %s63_s11 }
   0x6   :  { %p70_p3 = por %p69_p2, %p68_p1 }
   0x8   :  { %p71_p4 = pnand %p70_p3, %p64_p0 }
   0xa   :  { %74 = shalt.err (!%p71_p4)
}
   0xb   :  { %18 = dma.hbm_to_vmem [thread:$0]  %s126_s0, 256, %s16_s10, [#allocation3]  }
   0xc   :  { %95 = dma.done.wait [#allocation3], 256  }
   0xd   :  { %96 = vsyncadd [#allocation3], 4294967040  ;;  %v100_v0 = vmov 0   ;;  %v26_v1 = vld [vmem:[%s127_s1] sm:$0xff]  ;;  %v25_v3 = vld [vmem:[#allocation2 + $0x8] sm:$0xff]  ;;  %s101_s16 = smov [#allocation5]  }
   0xe   :  { %54 = vset.pattern.permute.xlu0 %v100_v0  ;;  %v24_v2 = vld [vmem:[#allocation2] sm:$0xff]  ;;  %s42_s17 = sshll.u32 %s101_s16, 4  ;;  %s43_s17 = int_to_ptr.vmem [resolvable:$true] %s42_s17 }
   0xf   :  { %29 = vperm.xlu0 %54, %v26_v1   ;;  %s75_s0 = scalar_lea.vmem %s43_s17, 256  ;;  %p80_p6 = scmp.lt.s32.totalorder %s43_s17, %s43_s17 }
  0x10   :  { %p76_p5 = scmp.ne.s32.totalorder %s43_s17, %s75_s0  ;;  %p81_p7 = scmp.lt.s32.totalorder %s75_s0, %s75_s0 }
  0x12   :  { %p82_p8 = por %p81_p7, %p80_p6 }
  0x14   :  { %p83_p9 = pnand %p82_p8, %p76_p5 }
  0x8a   :  { %v30_v4 = vpop.permute.xlu0 %29 }
  0x8b   :  { %v32_v5 = vmul.f32 %v30_v4, %v24_v2  ;;  %v33_v6 = vmul.f32 %v30_v4, %v25_v3 }
  0x8d   :  { %34 = vst [vmem:[#allocation5] sm:$0xff] %v32_v5  ;;  %35 = vst [vmem:[#allocation5 + $0x8] sm:$0xff] %v33_v6 }
  0x8e   :  { %86 = shalt.err (!%p83_p9)
}
  0x8f   :  { %45 = dma.vmem_to_hbm [thread:$0]  %s43_s17, 256, %s128_s2, [#allocation4]  }
  0x90   :  { %97 = dma.done.wait [#allocation4], 256  }
  0x91   :  { %98 = vsyncadd [#allocation4], 4294967040 }
  0x92   :  { %49 = vsyncpa [#allocation3], 1 }
  0x93   :  { %50 = vsyncpa [#allocation4], 1 }

</bundles_post_ra>
